<compile_context>
chip_gen: v7x
topology: tpu7x:2x2x1
jax: 0.10.0
libtpu: 0.0.40
codegen_flags: <defaults>
</compile_context>

<pallas_src>
import numpy as np
import jax
import jax.numpy as jnp
from jax.experimental import pallas as pl
from jax.experimental.pallas import tpu as pltpu


# -----------------------------------------------------------------------------
# Kernel 1: default config (graph_pooling='mean')
#   h_graph = global_mean_pool(h_node, batch); prediction = Linear(h_graph)
# Grid streams h_node over the node axis; the (B, D) pooled accumulator lives
# in VMEM scratch; per-graph 1/count and graph ids are tiny resident inputs;
# the prediction matmul + bias is fused on the last tile.
# -----------------------------------------------------------------------------
def _mean_pool_linear_kernel(batch_ref, h_ref, gid_ref, inv_cnt_ref,
                             wt_ref, b_ref, pred_ref, acc_ref):
    n = pl.program_id(0)

    @pl.when(n == 0)
    def _init():
        acc_ref[...] = jnp.zeros_like(acc_ref)

    # (1, TN) batch ids vs (B, 1) graph ids -> (B, TN) segment mask (VPU only;
    # the counts are precomputed outside, so no cross-lane reduce per tile).
    mask = (batch_ref[...] == gid_ref[...]).astype(h_ref.dtype)
    acc_ref[...] += jnp.dot(mask, h_ref[...],
                            preferred_element_type=jnp.float32)

    @pl.when(n == pl.num_programs(0) - 1)
    def _finalize():
        # inv_cnt is 0 for empty graphs -> pooled = 0 (PyG global_mean_pool).
        pooled = acc_ref[...] * inv_cnt_ref[...]
        pred_ref[...] = (jnp.dot(pooled, wt_ref[...],
                                 preferred_element_type=jnp.float32)
                         + b_ref[...])


def gnn_forward_mean(params, h_node, batch, num_graphs, tile_n=2048):
    """GNN.forward with graph_pooling='mean' (default).  Returns ([], prediction).

    h_node may be float32 or bfloat16; bf16 halves the dominant HBM stream
    (biggest win on v5e's ~820 GB/s HBM)."""
    N, D = h_node.shape
    T = params["pred_w"].shape[0]
    T_pad = 128 * ((T + 127) // 128)            # lane-dense prediction output

    batch = batch.astype(jnp.int32)
    cnt = jnp.bincount(batch, length=num_graphs).astype(jnp.float32)
    inv_cnt = jnp.where(cnt > 0, 1.0 / jnp.maximum(cnt, 1.0), 0.0)
    inv_cnt = inv_cnt.reshape(num_graphs, 1)
    gids = jnp.arange(num_graphs, dtype=jnp.int32).reshape(num_graphs, 1)

    tile_n = 128 * ((tile_n + 127) // 128)
    tile = max(128, min(tile_n, 128 * ((N + 127) // 128)))
    n_tiles = -(-N // tile)
    N_pad = n_tiles * tile
    if N_pad != N:
        # padded ids (-1) never match a graph id; padded rows are zeros so they
        # contribute nothing.
        h = jnp.pad(h_node, ((0, N_pad - N), (0, 0)))
        batch_p = jnp.pad(batch, (0, N_pad - N), constant_values=-1)
    else:
        h = h_node
        batch_p = batch
    batch2d = batch_p.reshape(1, N_pad)

    wt = jnp.zeros((D, T_pad), jnp.float32).at[:, :T].set(
        params["pred_w"].astype(jnp.float32).T)
    b = jnp.zeros((1, T_pad), jnp.float32).at[:, :T].set(
        params["pred_b"].astype(jnp.float32)[None, :])

    pred_pad = pl.pallas_call(
        _mean_pool_linear_kernel,
        out_shape=jax.ShapeDtypeStruct((num_graphs, T_pad), jnp.float32),
        grid=(n_tiles,),
        in_specs=[
            pl.BlockSpec((1, tile), lambda n: (0, n)),        # batch ids (int32)
            pl.BlockSpec((tile, D), lambda n: (n, 0)),        # h_node stream
            pl.BlockSpec((num_graphs, 1), lambda n: (0, 0)),  # graph ids (resident)
            pl.BlockSpec((num_graphs, 1), lambda n: (0, 0)),  # 1/count  (resident)
            pl.BlockSpec((D, T_pad), lambda n: (0, 0)),       # W^T (resident)
            pl.BlockSpec((1, T_pad), lambda n: (0, 0)),       # bias (resident)
        ],
        out_specs=pl.BlockSpec((num_graphs, T_pad), lambda n: (0, 0)),
        scratch_shapes=[pltpu.VMEM((num_graphs, D), jnp.float32)],
        compiler_params=pltpu.CompilerParams(
            dimension_semantics=("arbitrary",),               # reduction over N
            vmem_limit_bytes=32 * 1024 * 1024),
    )(batch2d, h, gids, inv_cnt, wt, b)

    constraints = []   # matches torch: constraints stays an empty list
    return constraints, pred_pad[:, :T]


# -----------------------------------------------------------------------------
# Kernel 2: graph_pooling='logical', train=False
#   sequential logic_and chain over padded node slots + cosine-sim prediction.
#   2-D grid: graph blocks ("parallel") x step blocks ("arbitrary").  The
#   (out_vec) carry lives in VMEM scratch; padded node rows stream in and the
#   step-major constraints stream out per step block; prediction is written
#   lane-dense on the last step block.
# -----------------------------------------------------------------------------
def _make_logic_chain_kernel(num_steps, block_steps, compute_dtype, masked,
                             unroll_static):
    cdt = compute_dtype

    def kernel(h0_ref, hrest_ref, w1a_ref, w1b_ref, b1_ref, w2_ref, b2_ref,
               tv_ref, nb2_ref, cons_ref, pred_ref, acc_ref):
        # h0_ref: (BB, D) f32; hrest_ref: (TS, BB, D) cdt;
        # cons_ref: (TS, BB, D) f32; pred_ref: (BB, 128) f32; acc_ref: (BB, D) f32
        s = pl.program_id(1)

        @pl.when(s == 0)
        def _init():
            acc_ref[...] = h0_ref[...].astype(jnp.float32)

        base = s * block_steps

        def logic_and_step(i, out_vec):
            hi = hrest_ref[i]                                 # (BB, D), cdt
            # relu(cat(out, hi) @ W1^T + b1) @ W2^T + b2   (eval -> no dropout);
            # W1^T is split so no in-kernel concat is needed.
            pre = (jnp.dot(out_vec.astype(cdt), w1a_ref[...],
                           preferred_element_type=jnp.float32)
                   + jnp.dot(hi, w1b_ref[...],
                             preferred_element_type=jnp.float32)
                   + b1_ref[...])
            v = jnp.maximum(pre, 0.0)
            new = (jnp.dot(v.astype(cdt), w2_ref[...],
                           preferred_element_type=jnp.float32)
                   + b2_ref[...])
            if masked:
                # padded steps (only in the final step block) hold the carry.
                keep = ((base + i) < num_steps).astype(jnp.float32)
                new = keep * new + (1.0 - keep) * out_vec
            cons_ref[i] = new            # dense (BB, D) unmasked store per step
            return new

        out_vec = acc_ref[...]
        if unroll_static:
            for i in range(block_steps):
                out_vec = logic_and_step(i, out_vec)
        else:
            out_vec = jax.lax.fori_loop(0, block_steps, logic_and_step,
                                        out_vec, unroll=4)
        acc_ref[...] = out_vec

        @pl.when(s == pl.num_programs(1) - 1)
        def _finalize():
            out = acc_ref[...]
            # prediction = sigmoid(10 * cosine(out, true_vector))
            t = tv_ref[...]                                   # (1, D)
            num = jnp.sum(out * t, axis=-1, keepdims=True)    # (BB, 1)
            na2 = jnp.sum(out * out, axis=-1, keepdims=True)
            nb2 = nb2_ref[0, 0]                               # hoisted ||t||^2
            # max(na*nb, 1e-8) == sqrt(max(na2*nb2, 1e-16)); rsqrt -> EUP.
            cos = num * jax.lax.rsqrt(jnp.maximum(na2 * nb2, 1e-16))
            sig = jax.nn.sigmoid(cos * 10.0)
            pred_ref[...] = jnp.broadcast_to(sig, pred_ref.shape)  # lane-dense

    return kernel


def _pad_graphs(h_node, batch, lengths, num_graphs_padded, true_vector):
    """Replicates GNN.padding_tensor without per-graph device syncs: one
    host-side length table + a single jittable scatter.  Layout (max_len, B, D)
    so the chain kernel indexes node slots on the leading axis."""
    N, D = h_node.shape
    max_len = int(np.max(lengths))
    offsets = np.zeros(len(lengths), dtype=np.int64)
    offsets[1:] = np.cumsum(lengths)[:-1]
    pos = (jnp.arange(N, dtype=jnp.int32)
           - jnp.asarray(offsets, dtype=jnp.int32)[batch])
    h_pad = jnp.broadcast_to(true_vector.astype(h_node.dtype)[None, None, :],
                             (max_len, num_graphs_padded, D))
    h_pad = h_pad.at[pos, batch].set(h_node)
    return h_pad, max_len


def gnn_forward_logical(params, h_node, batch, num_graphs, lengths=None,
                        compute_dtype=jnp.bfloat16, bb_max=128, ts_max=8):
    """GNN.forward with graph_pooling='logical', train=False.

    compute_dtype: matmul input dtype for the chain (bf16 default; f32
    accumulation always).  Use jnp.float32 for bit-tight validation."""
    N, D = h_node.shape
    B = num_graphs
    batch = batch.astype(jnp.int32)
    if lengths is None:
        # one host transfer for metadata, not per-graph int(jnp.sum(...)) syncs
        lengths = np.bincount(np.asarray(jax.device_get(batch)), minlength=B)
    lengths = np.asarray(lengths)

    tv = params["true_vector"]
    BB = B if B <= bb_max else bb_max           # graphs per block (fills MXU rows)
    n_gblocks = -(-B // BB)
    B_pad = n_gblocks * BB                      # padded graphs run on true_vector

    h_pad, max_len = _pad_graphs(h_node.astype(jnp.float32), batch, lengths,
                                 B_pad, tv)
    L = max_len - 1                             # number of logic_and steps

    if L == 0:
        # Degenerate chain (every graph has a single node): no logic_and steps.
        # (The torch code would raise here; we return an empty constraints
        # matrix and the cosine prediction of the lone node.)
        out = h_pad[0, :B, :]
        num = jnp.sum(out * tv[None, :], axis=-1)
        na = jnp.sqrt(jnp.sum(out * out, axis=-1))
        nb = jnp.sqrt(jnp.sum(tv * tv))
        pred = jax.nn.sigmoid(num / jnp.maximum(na * nb, 1e-8) * 10.0)
        return jnp.zeros((0, D), jnp.float32), pred

    TS = min(ts_max, L)                         # chain steps per grid block
    n_sblocks = -(-L // TS)
    L_pad = n_sblocks * TS
    masked = (L_pad != L)

    cdt = compute_dtype
    h0 = h_pad[0]                               # (B_pad, D) f32 (exact chain init)
    hrest = h_pad[1:].astype(cdt)               # (L, B_pad, D) streamed rows
    if masked:
        hrest = jnp.pad(hrest, ((0, L_pad - L), (0, 0), (0, 0)))

    # and_layer_1 weight is (D, 2D): split its transpose so that
    # cat(out, h) @ W1^T == out @ W1a^T + h @ W1b^T (no in-kernel concat).
    w1a_t = params["and1_w"][:, :D].T.astype(cdt)
    w1b_t = params["and1_w"][:, D:].T.astype(cdt)
    b1 = params["and1_b"].reshape(1, D).astype(jnp.float32)
    w2_t = params["and2_w"].T.astype(cdt)
    b2 = params["and2_b"].reshape(1, D).astype(jnp.float32)
    tv2 = tv.reshape(1, D).astype(jnp.float32)
    nb2 = jnp.sum(tv * tv).reshape(1, 1).astype(jnp.float32)

    # VMEM budget: streamed blocks are double-buffered by the pipeline.
    isz = jnp.dtype(cdt).itemsize
    est = (2 * TS * BB * D * isz            # hrest blocks
           + 2 * TS * BB * D * 4            # constraints blocks
           + 2 * BB * D * 4                 # h0 block
           + 2 * 3 * D * D * isz + 4 * D * 4
           + 2 * BB * 128 * 4               # prediction block
           + BB * D * 4)                    # carry scratch
    vmem_budget = int(min(48 * 1024 * 1024, max(32 * 1024 * 1024, 2 * est)))

    kernel = _make_logic_chain_kernel(num_steps=L, block_steps=TS,
                                      compute_dtype=cdt, masked=masked,
                                      unroll_static=(TS <= 16))
    full2d = lambda g, s: (0, 0)
    cons, pred = pl.pallas_call(
        kernel,
        out_shape=(jax.ShapeDtypeStruct((L_pad, B_pad, D), jnp.float32),
                   jax.ShapeDtypeStruct((B_pad, 128), jnp.float32)),
        grid=(n_gblocks, n_sblocks),
        in_specs=[
            pl.BlockSpec((BB, D), lambda g, s: (g, 0)),          # first node rows
            pl.BlockSpec((TS, BB, D), lambda g, s: (s, g, 0)),   # chain row stream
            pl.BlockSpec((D, D), full2d),                        # W1a^T
            pl.BlockSpec((D, D), full2d),                        # W1b^T
            pl.BlockSpec((1, D), full2d),                        # b1
            pl.BlockSpec((D, D), full2d),                        # W2^T
            pl.BlockSpec((1, D), full2d),                        # b2
            pl.BlockSpec((1, D), full2d),                        # true_vector
            pl.BlockSpec(memory_space=pltpu.MemorySpace.SMEM),   # ||tv||^2 scalar
        ],
        out_specs=(
            pl.BlockSpec((TS, BB, D), lambda g, s: (s, g, 0)),   # constraints
            pl.BlockSpec((BB, 128), lambda g, s: (g, 0)),        # prediction
        ),
        scratch_shapes=[pltpu.VMEM((BB, D), jnp.float32)],       # out_vec carry
        compiler_params=pltpu.CompilerParams(
            dimension_semantics=("parallel", "arbitrary"),
            vmem_limit_bytes=vmem_budget),
    )(h0, hrest, w1a_t, w1b_t, b1, w2_t, b2, tv2, nb2)

    # torch: cat(constraints, dim=1).view(-1, emb_dim) -> (B*L, D), graph-major.
    # cons is step-major (dense stores in-kernel); transpose once outside.
    constraints = jnp.transpose(cons[:L, :B], (1, 0, 2)).reshape(B * L, D)
    prediction = pred[:B, 0]                     # .view([-1])
    return constraints, prediction


# -----------------------------------------------------------------------------
# Deterministic parameter init (shapes from GNN.__init__; synthetic weights)
# -----------------------------------------------------------------------------
def init_params(key, emb_dim, num_tasks):
    ks = jax.random.split(key, 8)
    s = 0.05
    return {
        # graph_pred_linear: Linear(emb_dim, num_tasks)
        "pred_w": jax.random.normal(ks[0], (num_tasks, emb_dim), jnp.float32) * s,
        "pred_b": jax.random.normal(ks[1], (num_tasks,), jnp.float32) * s,
        # logical-pooling parameters
        "true_vector": jax.random.uniform(ks[2], (emb_dim,), jnp.float32, 0.0, 0.1),
        "and1_w": jax.random.normal(ks[3], (emb_dim, 2 * emb_dim), jnp.float32) * s,
        "and1_b": jax.random.normal(ks[4], (emb_dim,), jnp.float32) * s,
        "and2_w": jax.random.normal(ks[5], (emb_dim, emb_dim), jnp.float32) * s,
        "and2_b": jax.random.normal(ks[6], (emb_dim,), jnp.float32) * s,
        # not_layer_1 / not_layer_2 exist in __init__ but are unused in forward().
    }


# -----------------------------------------------------------------------------
# Plain-JAX references for verification (f32, highest matmul precision)
# -----------------------------------------------------------------------------
def _ref_mean(params, h_node, batch, num_graphs):
    hp = jax.lax.Precision.HIGHEST
    onehot = (batch[None, :] == jnp.arange(num_graphs)[:, None]).astype(jnp.float32)
    pooled = jnp.dot(onehot, h_node.astype(jnp.float32), precision=hp)
    pooled = pooled / jnp.sum(onehot, axis=1, keepdims=True)
    return jnp.dot(pooled, params["pred_w"].T, precision=hp) + params["pred_b"]


def _ref_logical(params, h_node, lengths):
    hp = jax.lax.Precision.HIGHEST
    D = h_node.shape[1]
    tv = params["true_vector"]
    max_len = int(max(lengths))
    rows, j = [], 0
    for k in lengths:
        g = h_node[j:j + k]
        j += k
        if k < max_len:
            pad = jnp.broadcast_to(tv[None, :], (max_len - k, D))
            g = jnp.concatenate([g, pad], axis=0)
        rows.append(g)
    h_pad = jnp.stack(rows, axis=0)                               # (B, max_len, D)
    out = h_pad[:, 0, :]
    cons = []
    for i in range(1, max_len):
        cat = jnp.concatenate([out, h_pad[:, i, :]], axis=1)
        v = jnp.maximum(jnp.dot(cat, params["and1_w"].T, precision=hp)
                        + params["and1_b"], 0.0)
        out = jnp.dot(v, params["and2_w"].T, precision=hp) + params["and2_b"]
        cons.append(out)
    constraints = jnp.concatenate(cons, axis=1).reshape(-1, D)
    num = jnp.sum(out * tv[None, :], axis=-1)
    na = jnp.sqrt(jnp.sum(out * out, axis=-1))
    nb = jnp.sqrt(jnp.sum(tv * tv))
    pred = jax.nn.sigmoid(num / jnp.maximum(na * nb, 1e-8) * 10.0)
    return constraints, pred


def _make_batch(lengths):
    return jnp.concatenate([jnp.full((l,), i, jnp.int32)
                            for i, l in enumerate(lengths)])


if __name__ == "__main__":
    emb_dim = 128
    num_tasks = 8

    key = jax.random.PRNGKey(0)
    k_h, k_p, k_h2, k_h3 = jax.random.split(key, 4)
    params = init_params(k_p, emb_dim, num_tasks)

    # ---- default config: graph_pooling='mean' (f32 stream) ----
    lengths = [5, 3]
    num_graphs = 2
    N = sum(lengths)
    # h_node stands in for the output of the (external) GNN_node_Virtualnode stack.
    h_node = jax.random.normal(k_h, (N, emb_dim), jnp.float32)
    batch = _make_batch(lengths)

    constraints_m, pred_m = gnn_forward_mean(params, h_node, batch, num_graphs)
    pred_m = jax.block_until_ready(pred_m)
    ref_m = _ref_mean(params, h_node, batch, num_graphs)
    assert pred_m.shape == (num_graphs, num_tasks)
    assert constraints_m == []
    assert jnp.allclose(pred_m, ref_m, atol=1e-3, rtol=1e-3)

    # bf16 h_node streaming path (halves the dominant HBM read)
    _, pred_m_bf16 = gnn_forward_mean(params, h_node.astype(jnp.bfloat16),
                                      batch, num_graphs)
    pred_m_bf16 = jax.block_until_ready(pred_m_bf16)
    assert jnp.allclose(pred_m_bf16, ref_m, atol=3e-2, rtol=3e-2)

    # larger multi-tile check: exercises the accumulation grid over N
    lengths2 = [150, 100, 50]
    N2 = sum(lengths2)
    h2 = jax.random.normal(k_h2, (N2, emb_dim), jnp.float32)
    batch2 = _make_batch(lengths2)
    _, pred2 = gnn_forward_mean(params, h2, batch2, len(lengths2), tile_n=128)
    pred2 = jax.block_until_ready(pred2)
    ref2 = _ref_mean(params, h2, batch2, len(lengths2))
    assert jnp.allclose(pred2, ref2, atol=1e-3, rtol=1e-3)

    # ---- graph_pooling='logical', train=False ----
    ref_c, ref_p = _ref_logical(params, h_node, lengths)

    # f32 chain (tight validation of the kernel structure)
    cons_f32, pred_f32 = gnn_forward_logical(params, h_node, batch, num_graphs,
                                             lengths=lengths,
                                             compute_dtype=jnp.float32)
    cons_f32 = jax.block_until_ready(cons_f32)
    pred_f32 = jax.block_until_ready(pred_f32)
    assert cons_f32.shape == (num_graphs * (max(lengths) - 1), emb_dim)
    assert pred_f32.shape == (num_graphs,)
    assert jnp.allclose(cons_f32, ref_c, atol=2e-3, rtol=2e-3)
    assert jnp.allclose(pred_f32, ref_p, atol=2e-3, rtol=2e-3)

    # bf16 chain (the performance default: bf16 MXU inputs, f32 accumulation)
    cons_bf, pred_bf = gnn_forward_logical(params, h_node, batch, num_graphs,
                                           lengths=lengths)
    cons_bf = jax.block_until_ready(cons_bf)
    pred_bf = jax.block_until_ready(pred_bf)
    assert jnp.allclose(cons_bf, ref_c, atol=2e-2, rtol=2e-2)
    assert jnp.allclose(pred_bf, ref_p, atol=2e-2)

    # medium chain: multiple step blocks + padded-step masking in the last block
    lengths3 = [12, 7, 9, 3, 10, 5]
    B3 = len(lengths3)
    N3 = sum(lengths3)
    h3 = jax.random.normal(k_h3, (N3, emb_dim), jnp.float32)
    batch3 = _make_batch(lengths3)
    cons3, pred3 = gnn_forward_logical(params, h3, batch3, B3, lengths=lengths3,
                                       compute_dtype=jnp.float32)
    cons3 = jax.block_until_ready(cons3)
    pred3 = jax.block_until_ready(pred3)
    ref_c3, ref_p3 = _ref_logical(params, h3, lengths3)
    assert cons3.shape == (B3 * (max(lengths3) - 1), emb_dim)
    assert jnp.allclose(cons3, ref_c3, atol=2e-3, rtol=2e-3)
    assert jnp.allclose(pred3, ref_p3, atol=2e-3, rtol=2e-3)

    print("KERNEL_OK")
</pallas_src>

<mosaic_0001>
module attributes {stable_mosaic.version = 11 : i64} {
  func.func @_mean_pool_linear_kernel(%arg0: i32, %arg1: memref<1x128xi32, #tpu.memory_space<vmem>>, %arg2: memref<128x128xf32, #tpu.memory_space<vmem>>, %arg3: memref<2x1xi32, #tpu.memory_space<vmem>>, %arg4: memref<2x1xf32, #tpu.memory_space<vmem>>, %arg5: memref<128x128xf32, #tpu.memory_space<vmem>>, %arg6: memref<1x128xf32, #tpu.memory_space<vmem>>, %arg7: memref<2x128xf32, #tpu.memory_space<vmem>>, %arg8: memref<2x128xf32, #tpu.memory_space<vmem>>) attributes {dimension_semantics = [#tpu.dimension_semantics<arbitrary>], iteration_bounds = array<i64: 1>, scalar_prefetch = 0 : i64, scratch_operands = 1 : i64, tpu.core_type = #tpu.core_type<tc>, window_params = [{transform_indices = @transform_0, window_bounds = array<i64: 1, 128>}, {transform_indices = @transform_1, window_bounds = array<i64: 128, 128>}, {pipeline_mode = #tpu.pipeline_mode<synchronous>, transform_indices = @transform_2, window_bounds = array<i64: 2, 1>}, {pipeline_mode = #tpu.pipeline_mode<synchronous>, transform_indices = @transform_3, window_bounds = array<i64: 2, 1>}, {pipeline_mode = #tpu.pipeline_mode<synchronous>, transform_indices = @transform_4, window_bounds = array<i64: 128, 128>}, {pipeline_mode = #tpu.pipeline_mode<synchronous>, transform_indices = @transform_5, window_bounds = array<i64: 1, 128>}, {pipeline_mode = #tpu.pipeline_mode<synchronous>, transform_indices = @transform_6, window_bounds = array<i64: 2, 128>}]} {
    %c0_i32 = arith.constant 0 : i32
    %0 = arith.cmpi eq, %arg0, %c0_i32 : i32
    %1 = arith.extui %0 : i1 to i32
    %c0_i32_0 = arith.constant 0 : i32
    %2 = arith.cmpi ne, %1, %c0_i32_0 : i32
    scf.if %2 {
      %cst_12 = arith.constant 0.000000e+00 : f32
      %18 = vector.broadcast %cst_12 : f32 to vector<2x128xf32>
      %c0_13 = arith.constant 0 : index
      %c0_14 = arith.constant 0 : index
      %19 = vector.load %arg8[%c0_13, %c0_14] : memref<2x128xf32, #tpu.memory_space<vmem>>, vector<2x128xf32>
      tpu.vector_store %arg8[%c0_13, %c0_14], %18 {strides = array<i32>} : memref<2x128xf32, #tpu.memory_space<vmem>>, vector<2x128xf32>,
    } else {
    }
    %c0 = arith.constant 0 : index
    %c0_1 = arith.constant 0 : index
    %3 = vector.load %arg1[%c0, %c0_1] : memref<1x128xi32, #tpu.memory_space<vmem>>, vector<1x128xi32>
    %c0_2 = arith.constant 0 : index
    %c0_3 = arith.constant 0 : index
    %4 = vector.load %arg3[%c0_2, %c0_3] : memref<2x1xi32, #tpu.memory_space<vmem>>, vector<2x1xi32>
    %5 = vector.broadcast %3 : vector<1x128xi32> to vector<2x128xi32>
    %6 = vector.broadcast %4 : vector<2x1xi32> to vector<2x128xi32>
    %7 = arith.cmpi eq, %5, %6 : vector<2x128xi32>
    %8 = arith.extui %7 : vector<2x128xi1> to vector<2x128xi32>
    %9 = arith.sitofp %8 : vector<2x128xi32> to vector<2x128xf32>
    %c0_4 = arith.constant 0 : index
    %c0_5 = arith.constant 0 : index
    %10 = vector.load %arg8[%c0_4, %c0_5] : memref<2x128xf32, #tpu.memory_space<vmem>>, vector<2x128xf32>
    %c0_6 = arith.constant 0 : index
    %c0_7 = arith.constant 0 : index
    %11 = vector.load %arg2[%c0_6, %c0_7] : memref<128x128xf32, #tpu.memory_space<vmem>>, vector<128x128xf32>
    %cst = arith.constant dense<0.000000e+00> : vector<2x128xf32>
    %12 = tpu.matmul %9, %11, %cst {dimension_numbers = #tpu.dot_dimension_numbers<[1], [0], [0], [1], [0, 0, 1, 1], [], []>} : vector<2x128xf32>, vector<128x128xf32>, vector<2x128xf32> -> vector<2x128xf32>
    %13 = arith.addf %10, %12 : vector<2x128xf32>
    %c0_8 = arith.constant 0 : index
    %c0_9 = arith.constant 0 : index
    %14 = vector.load %arg8[%c0_8, %c0_9] : memref<2x128xf32, #tpu.memory_space<vmem>>, vector<2x128xf32>
    tpu.vector_store %arg8[%c0_8, %c0_9], %13 {strides = array<i32>} : memref<2x128xf32, #tpu.memory_space<vmem>>, vector<2x128xf32>,
    %c0_i32_10 = arith.constant 0 : i32
    %15 = arith.cmpi eq, %arg0, %c0_i32_10 : i32
    %16 = arith.extui %15 : i1 to i32
    %c0_i32_11 = arith.constant 0 : i32
    %17 = arith.cmpi ne, %16, %c0_i32_11 : i32
    scf.if %17 {
      %c0_12 = arith.constant 0 : index
      %c0_13 = arith.constant 0 : index
      %18 = vector.load %arg8[%c0_12, %c0_13] : memref<2x128xf32, #tpu.memory_space<vmem>>, vector<2x128xf32>
      %c0_14 = arith.constant 0 : index
      %c0_15 = arith.constant 0 : index
      %19 = vector.load %arg4[%c0_14, %c0_15] : memref<2x1xf32, #tpu.memory_space<vmem>>, vector<2x1xf32>
      %20 = vector.broadcast %19 : vector<2x1xf32> to vector<2x128xf32>
      %21 = arith.mulf %18, %20 : vector<2x128xf32>
      %c0_16 = arith.constant 0 : index
      %c0_17 = arith.constant 0 : index
      %22 = vector.load %arg5[%c0_16, %c0_17] : memref<128x128xf32, #tpu.memory_space<vmem>>, vector<128x128xf32>
      %cst_18 = arith.constant dense<0.000000e+00> : vector<2x128xf32>
      %23 = tpu.matmul %21, %22, %cst_18 {dimension_numbers = #tpu.dot_dimension_numbers<[1], [0], [0], [1], [0, 0, 1, 1], [], []>} : vector<2x128xf32>, vector<128x128xf32>, vector<2x128xf32> -> vector<2x128xf32>
      %c0_19 = arith.constant 0 : index
      %c0_20 = arith.constant 0 : index
      %24 = vector.load %arg6[%c0_19, %c0_20] : memref<1x128xf32, #tpu.memory_space<vmem>>, vector<1x128xf32>
      %25 = vector.broadcast %24 : vector<1x128xf32> to vector<2x128xf32>
      %26 = arith.addf %23, %25 : vector<2x128xf32>
      %c0_21 = arith.constant 0 : index
      %c0_22 = arith.constant 0 : index
      %27 = vector.load %arg7[%c0_21, %c0_22] : memref<2x128xf32, #tpu.memory_space<vmem>>, vector<2x128xf32>
      tpu.vector_store %arg7[%c0_21, %c0_22], %26 {strides = array<i32>} : memref<2x128xf32, #tpu.memory_space<vmem>>, vector<2x128xf32>,
    } else {
    }
    return
  }
  func.func @transform_0(%arg0: i32) -> (i32, i32) {
    %c0_i32 = arith.constant 0 : i32
    %c0_i32_0 = arith.constant 0 : i32
    return %c0_i32, %arg0 : i32, i32
  }
  func.func @transform_1(%arg0: i32) -> (i32, i32) {
    %c0_i32 = arith.constant 0 : i32
    %c0_i32_0 = arith.constant 0 : i32
    return %arg0, %c0_i32 : i32, i32
  }
  func.func @transform_2(%arg0: i32) -> (i32, i32) {
    %c0_i32 = arith.constant 0 : i32
    %c0_i32_0 = arith.constant 0 : i32
    %c0_i32_1 = arith.constant 0 : i32
    return %c0_i32, %c0_i32_0 : i32, i32
  }
  func.func @transform_3(%arg0: i32) -> (i32, i32) {
    %c0_i32 = arith.constant 0 : i32
    %c0_i32_0 = arith.constant 0 : i32
    %c0_i32_1 = arith.constant 0 : i32
    return %c0_i32, %c0_i32_0 : i32, i32
  }
  func.func @transform_4(%arg0: i32) -> (i32, i32) {
    %c0_i32 = arith.constant 0 : i32
    %c0_i32_0 = arith.constant 0 : i32
    %c0_i32_1 = arith.constant 0 : i32
    return %c0_i32, %c0_i32_0 : i32, i32
  }
  func.func @transform_5(%arg0: i32) -> (i32, i32) {
    %c0_i32 = arith.constant 0 : i32
    %c0_i32_0 = arith.constant 0 : i32
    %c0_i32_1 = arith.constant 0 : i32
    return %c0_i32, %c0_i32_0 : i32, i32
  }
  func.func @transform_6(%arg0: i32) -> (i32, i32) {
    %c0_i32 = arith.constant 0 : i32
    %c0_i32_0 = arith.constant 0 : i32
    %c0_i32_1 = arith.constant 0 : i32
    return %c0_i32, %c0_i32_0 : i32, i32
  }
}

</mosaic_0001>

<bundles_post_ra>
// kernel: tpu_custom_call.1
= control target key start
LH: loop header
LB: loop body
LE: loop exit
PB: predicated region body
PF: predicated region fallthrough
CT: control target
= control target key end

     0   :  { %11 = vsyncpa [#allocation4], 0  ;;  %s627_s0 = inlined_call_operand.vmem [shape: s32[1,128], index: 0, kind: input, shape index: {}]   ;;  %s628_s1 = inlined_call_operand.hbm [shape: f32[128,128], index: 1, kind: input, shape index: {}]   ;;  %s629_s2 = inlined_call_operand.vmem [shape: s32[2,1], index: 2, kind: input, shape index: {}]   ;;  %s630_s3 = inlined_call_operand.vmem [shape: f32[2,1], index: 3, kind: input, shape index: {}]   ;;  %s631_s4 = inlined_call_operand.hbm [shape: f32[128,128], index: 4, kind: input, shape index: {}]   ;;  %s632_s5 = inlined_call_operand.vmem [shape: f32[1,128], index: 5, kind: input, shape index: {}]   ;;  %s633_s6 = inlined_call_operand.hbm [shape: f32[2,128], index: 6, kind: output, shape index: {}]  }
   0x1   :  { %12 = vsyncpa [#allocation7], 0 }
   0x2   :  { %13 = vsyncpa [#allocation5], 0  ;;  %s518_s21 = smov [#allocation3]   ;;  %s446_s25 = scalar_lea.hbm %s628_s1, 2048 }
   0x3   :  { %s21_s22 = sshll.u32 %s518_s21, 4  ;;  %p447_p0 = scmp.ne.s32.totalorder %s628_s1, %s446_s25  ;;  %s22_s22 = int_to_ptr.vmem [resolvable:$true] %s21_s22 }
   0x4   :  { %p450_p1 = scmp.lt.u32.totalorder %s446_s25, %s628_s1 }
   0x6   :  { %p452_p2 = pnand %p450_p1, %p447_p0 }
   0x8   :  { %455 = shalt.err (!%p452_p2)
}
   0x9   :  { %s456_s30 = scalar_lea.vmem %s22_s22, 2048  ;;  %p461_p4 = scmp.lt.s32.totalorder %s22_s22, %s22_s22 }
   0xa   :  { %p457_p3 = scmp.ne.s32.totalorder %s22_s22, %s456_s30  ;;  %p462_p5 = scmp.lt.s32.totalorder %s456_s30, %s456_s30 }
   0xc   :  { %p463_p6 = por %p462_p5, %p461_p4 }
   0xe   :  { %p464_p7 = pnand %p463_p6, %p457_p3 }
  0x10   :  { %467 = shalt.err (!%p464_p7)
}
  0x11   :  { %s519_s7 = smov 128   ;;  %s520_s8 = smov 8  }
  0x12   :  { %27 = dma.hbm_to_vmem [thread:$0]  %s628_s1, 2048, %s22_s22, [#allocation4], %s519_s7, %s519_s7, %s520_s8  }
  0x13   :  { %s521_s11 = smov [#allocation6]   ;;  %s468_s15 = scalar_lea.hbm %s631_s4, 2048 }
  0x14   :  { %s37_s12 = sshll.u32 %s521_s11, 4  ;;  %p469_p8 = scmp.ne.s32.totalorder %s631_s4, %s468_s15  ;;  %s38_s12 = int_to_ptr.vmem [resolvable:$true] %s37_s12 }
  0x15   :  { %p472_p9 = scmp.lt.u32.totalorder %s468_s15, %s631_s4 }
  0x17   :  { %p474_p10 = pnand %p472_p9, %p469_p8 }
  0x19   :  { %477 = shalt.err (!%p474_p10)
}
  0x1a   :  { %s478_s20 = scalar_lea.vmem %s38_s12, 2048  ;;  %p483_p12 = scmp.lt.s32.totalorder %s38_s12, %s38_s12 }
  0x1b   :  { %p479_p11 = scmp.ne.s32.totalorder %s38_s12, %s478_s20  ;;  %p484_p13 = scmp.lt.s32.totalorder %s478_s20, %s478_s20 }
  0x1d   :  { %p485_p0 = por %p484_p13, %p483_p12 }
  0x1f   :  { %p486_p1 = pnand %p485_p0, %p479_p11 }
  0x21   :  { %489 = shalt.err (!%p486_p1)
}
  0x22   :  { %43 = dma.hbm_to_vmem [thread:$0]  %s631_s4, 2048, %s38_s12, [#allocation7], %s519_s7, %s519_s7, %s520_s8  }
  0x23   :  { %512 = dma.done.wait [#allocation4], 2048  }
  0x24   :  { %513 = vsyncadd [#allocation4], 4294965248 }
  0x25   :  { %514 = dma.done.wait [#allocation7], 2048  }
  0x26   :  { %515 = vsyncadd [#allocation7], 4294965248  ;;  %v522_v0 = vmov 0   ;;  %v523_v1 = vmov 0.0|0.0   ;;  %v58_v2 = vld [vmem:[%s629_s2] sm:$0x3] }
  0x27   :  { %445 = vset.pattern.permute.xlu0 %v522_v0  ;;  %387 = vmatprep.subr.bf16.mxu0 %v523_v1  ;;  %v70_v3 = vld [vmem:[#allocation3] sm:$0xff]  ;;  %v71_v4 = vld [vmem:[#allocation3 + $0x8] sm:$0xff]  ;;  %v72_v5 = vld [vmem:[#allocation3 + $0x10] sm:$0xff]  ;;  %v524_v7 = vmov 0.0   ;;  %vm525_vm0 = vmmov 0   ;;  %v526_v46 = vmov 1.0  }
  0x28   :  { %411 = vmatprep.subr.bf16.mxu1 %v523_v1  ;;  %64 = vperm.xlu0 %445, %v58_v2   ;;  %v73_v6 = vld [vmem:[#allocation3 + $0x18] sm:$0xff]  ;;  %56 = vst [vmem:[#allocation2] sm:$0x3] %v524_v7  ;;  %v388_v9 = vpack.c.bf16 %v71_v4, %v70_v3  ;;  %v74_v11 = vld [vmem:[#allocation3 + $0x20] sm:$0xff]  ;;  %v75_v12 = vld [vmem:[#allocation3 + $0x28] sm:$0xff]  ;;  %s527_s26 = smov [#allocation8]  }
  0x29   :  { %v162_v8 = vld [vmem:[%s630_s3] sm:$0x3]  ;;  %349 = vmatprep.mubr.msk.f32.mxu0 %vm525_vm0, %v524_v7  ;;  %384 = vmatprep.mubr.msk.f32.mxu1 %vm525_vm0, %v524_v7  ;;  %v391_v10 = vpack.c.bf16 %v73_v6, %v72_v5  ;;  %v169_v13 = vld [vmem:[#allocation6] sm:$0xff]  ;;  %v170_v14 = vld [vmem:[#allocation6 + $0x8] sm:$0xff]  ;;  %v394_v18 = vpack.c.bf16 %v75_v12, %v74_v11  ;;  %s269_s27 = sshll.u32 %s527_s26, 4  ;;  %s270_s27 = int_to_ptr.vmem [resolvable:$true] %s269_s27 }
  0x2a   :  { %389 = vmatpush3.bf16.msra.mxu0 %v388_v9  ;;  %v412_v15 = vpack.c.bf16 %v170_v14, %v169_v13  ;;  %v171_v16 = vld [vmem:[#allocation6 + $0x10] sm:$0xff]  ;;  %v172_v17 = vld [vmem:[#allocation6 + $0x18] sm:$0xff]  ;;  %v173_v22 = vld [vmem:[#allocation6 + $0x20] sm:$0xff]  ;;  %s490_s28 = scalar_lea.vmem %s270_s27, 32  ;;  %p495_p3 = scmp.lt.s32.totalorder %s270_s27, %s270_s27 }
  0x2b   :  { %390 = vmatprep.subr.bf16.mxu0 %v523_v1  ;;  %v76_v19 = vld [vmem:[#allocation3 + $0x30] sm:$0xff]  ;;  %v77_v20 = vld [vmem:[#allocation3 + $0x38] sm:$0xff]  ;;  %v415_v21 = vpack.c.bf16 %v172_v17, %v171_v16  ;;  %v174_v23 = vld [vmem:[#allocation6 + $0x28] sm:$0xff]  ;;  %p491_p2 = scmp.ne.s32.totalorder %s270_s27, %s490_s28  ;;  %p496_p4 = scmp.lt.s32.totalorder %s490_s28, %s490_s28 }
  0x2c   :  { %165 = vperm.xlu0 %445, %v162_v8   ;;  %413 = vmatpush3.bf16.msra.mxu1 %v412_v15  ;;  %v397_v24 = vpack.c.bf16 %v77_v20, %v76_v19  ;;  %v78_v25 = vld [vmem:[#allocation3 + $0x40] sm:$0xff]  ;;  %v79_v26 = vld [vmem:[#allocation3 + $0x48] sm:$0xff]  ;;  %v418_v27 = vpack.c.bf16 %v174_v23, %v173_v22  ;;  %v175_v28 = vld [vmem:[#allocation6 + $0x30] sm:$0xff] }
  0x2d   :  { %414 = vmatprep.subr.bf16.mxu1 %v523_v1  ;;  %v176_v29 = vld [vmem:[#allocation6 + $0x38] sm:$0xff]  ;;  %v400_v30 = vpack.c.bf16 %v79_v26, %v78_v25  ;;  %v80_v31 = vld [vmem:[#allocation3 + $0x50] sm:$0xff]  ;;  %v177_v34 = vld [vmem:[#allocation6 + $0x40] sm:$0xff]  ;;  %p497_p5 = por %p496_p4, %p495_p3 }
  0x2e   :  { %392 = vmatpush3.bf16.msra.mxu0 %v391_v10  ;;  %v81_v32 = vld [vmem:[#allocation3 + $0x58] sm:$0xff]  ;;  %v421_v33 = vpack.c.bf16 %v176_v29, %v175_v28  ;;  %v178_v35 = vld [vmem:[#allocation6 + $0x48] sm:$0xff]  ;;  %v82_v37 = vld [vmem:[#allocation3 + $0x60] sm:$0xff] }
  0x2f   :  { %393 = vmatprep.subr.bf16.mxu0 %v523_v1  ;;  %v403_v36 = vpack.c.bf16 %v81_v32, %v80_v31  ;;  %v83_v38 = vld [vmem:[#allocation3 + $0x68] sm:$0xff]  ;;  %v424_v39 = vpack.c.bf16 %v178_v35, %v177_v34  ;;  %v84_v41 = vld [vmem:[#allocation3 + $0x70] sm:$0xff]  ;;  %v85_v42 = vld [vmem:[#allocation3 + $0x78] sm:$0xff]  ;;  %p498_p6 = pnand %p497_p5, %p491_p2 }
  0x30   :  { %416 = vmatpush3.bf16.msra.mxu1 %v415_v21  ;;  %v406_v40 = vpack.c.bf16 %v83_v38, %v82_v37  ;;  %v409_v43 = vpack.c.bf16 %v85_v42, %v84_v41  ;;  %v279_v44 = vld [vmem:[%s627_s0] ss:$0 sm:$0xff]  ;;  %v179_v47 = vld [vmem:[#allocation6 + $0x50] sm:$0xff]  ;;  %v181_v50 = vld [vmem:[#allocation6 + $0x60] sm:$0xff] }
  0x31   :  { %417 = vmatprep.subr.bf16.mxu1 %v523_v1  ;;  %v180_v48 = vld [vmem:[#allocation6 + $0x58] sm:$0xff]  ;;  %v182_v51 = vld [vmem:[#allocation6 + $0x68] sm:$0xff]  ;;  %v183_v52 = vld [vmem:[#allocation6 + $0x70] sm:$0xff] }
  0x32   :  { %395 = vmatpush3.bf16.msra.mxu0 %v394_v18  ;;  %v427_v49 = vpack.c.bf16 %v180_v48, %v179_v47  ;;  %v430_v53 = vpack.c.bf16 %v182_v51, %v181_v50  ;;  %v184_v54 = vld [vmem:[#allocation6 + $0x78] sm:$0xff] }
  0x33   :  { %396 = vmatprep.subr.bf16.mxu0 %v523_v1  ;;  %v433_v55 = vpack.c.bf16 %v184_v54, %v183_v52  ;;  %v69_v56 = vld [vmem:[#allocation2] sm:$0x3] }
  0x34   :  { %419 = vmatpush3.bf16.msra.mxu1 %v418_v27  ;;  %v282_v63 = vld [vmem:[%s632_s5] ss:$0 sm:$0xff] }
  0x35   :  { %420 = vmatprep.subr.bf16.mxu1 %v523_v1 }
  0x36   :  { %398 = vmatpush3.bf16.msra.mxu0 %v397_v24 }
  0x37   :  { %399 = vmatprep.subr.bf16.mxu0 %v523_v1 }
  0x38   :  { %422 = vmatpush3.bf16.msra.mxu1 %v421_v33 }
  0x39   :  { %423 = vmatprep.subr.bf16.mxu1 %v523_v1 }
  0x3a   :  { %401 = vmatpush3.bf16.msra.mxu0 %v400_v30 }
  0x3b   :  { %402 = vmatprep.subr.bf16.mxu0 %v523_v1 }
  0x3c   :  { %425 = vmatpush3.bf16.msra.mxu1 %v424_v39 }
  0x3d   :  { %426 = vmatprep.subr.bf16.mxu1 %v523_v1 }
  0x3e   :  { %404 = vmatpush3.bf16.msra.mxu0 %v403_v36 }
  0x3f   :  { %405 = vmatprep.subr.bf16.mxu0 %v523_v1 }
  0x40   :  { %428 = vmatpush3.bf16.msra.mxu1 %v427_v49 }
  0x41   :  { %429 = vmatprep.subr.bf16.mxu1 %v523_v1 }
  0x42   :  { %407 = vmatpush3.bf16.msra.mxu0 %v406_v40 }
  0x43   :  { %408 = vmatprep.subr.bf16.mxu0 %v523_v1 }
  0x44   :  { %431 = vmatpush3.bf16.msra.mxu1 %v430_v53 }
  0x45   :  { %432 = vmatprep.subr.bf16.mxu1 %v523_v1 }
  0x46   :  { %410 = vmatpush3.bf16.msra.mxu0 %v409_v43 }
  0x48   :  { %434 = vmatpush3.bf16.msra.mxu1 %v433_v55 }
  0xa7   :  { %v65_v45 = vpop.permute.xlu0 %64 }
  0xa8   :  { %vm66_vm1 = vcmp.eq.s32.totalorder %v279_v44, %v65_v45 }
  0xa9   :  { %350 = vmatmul.mubr.msk.f32.vlgmr.msra.gmra.mrb[0].mxu0 %vm66_vm1, %v526_v46 }
  0xab   :  { %v166_v60 = vpop.permute.xlu0 %165 }
 0x17c   :  { %v152_v57 = vpop.f32.mrb[0].mxu0 }
 0x17d   :  { %v156_v58 = vadd.f32 %v152_v57, %v69_v56  ;;  %v351_v59 = vpop.f32.mrb[1].mxu0 }
 0x17f   :  { %157 = vst [vmem:[#allocation2] sm:$0x3] %v156_v58 }
 0x186   :  { %v161_v61 = vld [vmem:[#allocation2] sm:$0x3] }
 0x187   :  { %v168_v62 = vmul.f32 %v166_v60, %v161_v61 }
 0x189   :  { %385 = vmatmul.mubr.f32.vlgmr.msra.gmra.mrb[0].mxu1 %v168_v62 }
 0x25c   :  { %v258_v0 = vpop.f32.mrb[0].mxu1 }
 0x25d   :  { %v259_v2 = vadd.f32 %v282_v63, %v258_v0  ;;  %v386_v3 = vpop.f32.mrb[1].mxu1 }
 0x25f   :  { %262 = vst [vmem:[#allocation8] sm:$0x3] %v259_v2 }
 0x260   :  { %501 = shalt.err (!%p498_p6)
}
 0x261   :  { %s502_s7 = scalar_lea.hbm %s633_s6, 32 }
 0x262   :  { %p503_p7 = scmp.ne.s32.totalorder %s633_s6, %s502_s7  ;;  %p506_p8 = scmp.lt.u32.totalorder %s502_s7, %s633_s6 }
 0x264   :  { %p508_p9 = pnand %p506_p8, %p503_p7 }
 0x266   :  { %511 = shalt.err (!%p508_p9)
}
 0x267   :  { %272 = dma.vmem_to_hbm [thread:$0]  %s270_s27, 32, %s633_s6, [#allocation5]  }
 0x268   :  { %516 = dma.done.wait [#allocation5], 32  }
 0x269   :  { %517 = vsyncadd [#allocation5], 4294967264 }
 0x26a   :  { %276 = vsyncpa [#allocation4], 1 }
 0x26b   :  { %277 = vsyncpa [#allocation7], 1 }
 0x26c   :  { %278 = vsyncpa [#allocation5], 1 }

</bundles_post_ra>
